<compile_context>
chip_gen: v6e
topology: v6e:2x2x1
jax: 0.10.0
libtpu: 0.0.40
codegen_flags: <defaults>
</compile_context>

<pallas_src>
import functools
import math

import jax
import jax.numpy as jnp
from jax import lax
from jax.experimental import pallas as pl
from jax.experimental.pallas import tpu as pltpu


# ------------------------- fused attention kernel -------------------------- #
def _fused_mha_kernel(x_ref, w_in_ref, b_in_ref, w_out_ref, b_out_ref,
                      *out_and_scratch, num_heads, head_dim, seq_len,
                      batch_block, need_weights):
    """One grid step = `batch_block` batch elements, all heads."""
    H, D, L, BN = num_heads, head_dim, seq_len, batch_block
    E = H * D

    if need_weights:
        out_ref, attn_ref, o_acc = out_and_scratch
    else:
        out_ref, o_acc = out_and_scratch
        attn_ref = None

    # Packed in-projection over all batch_block elements at once.
    # w_in_ref is pre-transposed -> (E, 3E) lane-dense RHS; q columns already
    # carry the 1/sqrt(D) scale (folded in the wrapper).
    x = x_ref[...].reshape(BN * L, E)                      # free leading-dim merge
    qkv = (jnp.dot(x, w_in_ref[...], preferred_element_type=jnp.float32)
           + b_in_ref[...])                                # (BN*L, 3E)

    for b in range(BN):            # static unroll; all slices are static views
        r0 = b * L
        attn_acc = None
        for h in range(H):
            qh = qkv[r0:r0 + L, h * D:(h + 1) * D]                     # (L, D)
            kh = qkv[r0:r0 + L, E + h * D:E + (h + 1) * D]             # (L, D)
            vh = qkv[r0:r0 + L, 2 * E + h * D:2 * E + (h + 1) * D]     # (L, D)

            # scores: contract the D axes directly (no kh.T / XLU transpose)
            s = lax.dot_general(qh, kh, (((1,), (1,)), ((), ())),
                                preferred_element_type=jnp.float32)    # (L, L)

            m = jnp.max(s, axis=-1, keepdims=True)
            e = jnp.exp(s - m)
            p = e * pl.reciprocal(jnp.sum(e, axis=-1, keepdims=True),
                                  approx=True)                         # softmax

            if need_weights:
                attn_acc = p if attn_acc is None else attn_acc + p

            # Write this head's context straight into its concat-layout slice
            # of the VMEM scratch (no jnp.concatenate, no long live ranges).
            o_acc[r0:r0 + L, h * D:(h + 1) * D] = jnp.dot(
                p, vh, preferred_element_type=jnp.float32)

        if need_weights:
            attn_ref[b] = attn_acc * (1.0 / H)             # head average

    # Output projection over the whole (BN*L, E) block (w_out pre-transposed).
    out = (jnp.dot(o_acc[...], w_out_ref[...], preferred_element_type=jnp.float32)
           + b_out_ref[...])                               # (BN*L, E)
    out_ref[...] = out.reshape(BN, L, E)


# ------------------------------- wrapper ----------------------------------- #
@functools.partial(jax.jit,
                   static_argnames=("num_heads", "batch_block", "need_weights"))
def multihead_self_attention(x, params, num_heads, batch_block=1,
                             need_weights=True):
    """x: (L, N, E) float32.

    Returns (attn_output (L, N, E), attn_weights (N, L, L) or None).
    """
    L, N, E = x.shape
    H = num_heads
    D = E // H
    BN = batch_block
    assert E == H * D and N % BN == 0 and L % 8 == 0
    w_in, b_in, w_out, b_out = params

    # One-time layout plumbing outside the kernel: lane-dense (K, N) weights,
    # the q-scale folded into the in-projection, batch-major activations.
    scale = 1.0 / math.sqrt(D)
    col_scale = jnp.concatenate([jnp.full((E,), scale, jnp.float32),
                                 jnp.ones((2 * E,), jnp.float32)])
    w_in_t = jnp.transpose(w_in) * col_scale[None, :]     # (E, 3E), q cols scaled
    b_in2 = (b_in * col_scale).reshape(1, 3 * E)
    w_out_t = jnp.transpose(w_out)                        # (E, E)
    b_out2 = b_out.reshape(1, E)
    x_nle = jnp.transpose(x, (1, 0, 2))                   # (N, L, E)
    # TODO(synk): switching the call contract to batch-major (N, L, E) in/out
    # would drop these two wrapper transposes (extra HBM pass at real sizes).

    kernel = functools.partial(_fused_mha_kernel, num_heads=H, head_dim=D,
                               seq_len=L, batch_block=BN,
                               need_weights=need_weights)

    if need_weights:
        out_shape = (jax.ShapeDtypeStruct((N, L, E), jnp.float32),
                     jax.ShapeDtypeStruct((N, L, L), jnp.float32))
        out_specs = (pl.BlockSpec((BN, L, E), lambda n: (n, 0, 0)),
                     pl.BlockSpec((BN, L, L), lambda n: (n, 0, 0)))
    else:
        out_shape = jax.ShapeDtypeStruct((N, L, E), jnp.float32)
        out_specs = pl.BlockSpec((BN, L, E), lambda n: (n, 0, 0))

    res = pl.pallas_call(
        kernel,
        out_shape=out_shape,
        grid=(N // BN,),
        in_specs=[
            pl.BlockSpec((BN, L, E), lambda n: (n, 0, 0)),   # x (per batch blk)
            pl.BlockSpec((E, 3 * E), lambda n: (0, 0)),      # w_in^T (scaled)
            pl.BlockSpec((1, 3 * E), lambda n: (0, 0)),      # b_in  (scaled)
            pl.BlockSpec((E, E), lambda n: (0, 0)),          # w_out^T
            pl.BlockSpec((1, E), lambda n: (0, 0)),          # b_out
        ],
        out_specs=out_specs,
        scratch_shapes=[pltpu.VMEM((BN * L, E), jnp.float32)],  # concat-heads buf
        compiler_params=pltpu.CompilerParams(
            dimension_semantics=("parallel",),
            vmem_limit_bytes=64 * 1024 * 1024),
        # TODO(synk): mark the constant weight specs pipeline_mode=pl.Buffered(1)
        # once single-buffering of constant blocks is stable, to halve their
        # VMEM footprint at realistic E.
    )(x_nle, w_in_t, b_in2, w_out_t, b_out2)

    if need_weights:
        out_nle, attn = res
        return jnp.transpose(out_nle, (1, 0, 2)), attn
    return jnp.transpose(res, (1, 0, 2)), None


# --------------------------- reference (pure JAX) --------------------------- #
def _reference(x, params, num_heads):
    L, N, E = x.shape
    H = num_heads
    D = E // H
    w_in, b_in, w_out, b_out = params
    qkv = x.reshape(L * N, E) @ w_in.T + b_in
    q, k, v = jnp.split(qkv, 3, axis=-1)
    q = q * (1.0 / math.sqrt(D))
    f = lambda t: t.reshape(L, N * H, D).transpose(1, 0, 2)
    qh, kh, vh = f(q), f(k), f(v)
    s = jnp.einsum("bld,bmd->blm", qh, kh)
    p = jax.nn.softmax(s, axis=-1)
    o = jnp.einsum("blm,bmd->bld", p, vh)
    o = o.transpose(1, 0, 2).reshape(L * N, E) @ w_out.T + b_out
    return o.reshape(L, N, E), p.reshape(N, H, L, L).mean(axis=1)


# ---------------------------------- main ------------------------------------ #
if __name__ == "__main__":
    L, N, E, H = 8, 2, 32, 4   # seq, batch, embed_dim, num_heads (dropout=0.0)

    key = jax.random.PRNGKey(0)
    k_x, k_win, k_bin, k_wout, k_bout = jax.random.split(key, 5)

    x = jax.random.normal(k_x, (L, N, E), dtype=jnp.float32)

    # deterministic synthetic parameters (shapes from nn.MultiheadAttention)
    w_in = jax.random.normal(k_win, (3 * E, E), dtype=jnp.float32) * 0.05
    b_in = jax.random.normal(k_bin, (3 * E,), dtype=jnp.float32) * 0.05
    w_out = jax.random.normal(k_wout, (E, E), dtype=jnp.float32) * 0.05
    b_out = jax.random.normal(k_bout, (E,), dtype=jnp.float32) * 0.05
    params = (w_in, b_in, w_out, b_out)

    out, attn = multihead_self_attention(x, params, num_heads=H)
    out = jax.block_until_ready(out)
    attn = jax.block_until_ready(attn)

    ref_out, ref_attn = _reference(x, params, num_heads=H)
    assert out.shape == (L, N, E) and attn.shape == (N, L, L)
    # approx=True reciprocal -> slightly relaxed tolerance vs. exact divide
    assert jnp.allclose(out, ref_out, atol=2e-3, rtol=2e-3)
    assert jnp.allclose(attn, ref_attn, atol=2e-3, rtol=2e-3)

    # need_weights=False fast path (no (N, L, L) writeback)
    out_nw, attn_nw = multihead_self_attention(x, params, num_heads=H,
                                               need_weights=False)
    out_nw = jax.block_until_ready(out_nw)
    assert attn_nw is None
    assert jnp.allclose(out_nw, ref_out, atol=2e-3, rtol=2e-3)

    print("KERNEL_OK")
</pallas_src>

<mosaic_0001>
module attributes {stable_mosaic.version = 11 : i64} {
  func.func @_fused_mha_kernel(%arg0: i32, %arg1: memref<1x8x32xf32, #tpu.memory_space<vmem>>, %arg2: memref<32x96xf32, #tpu.memory_space<vmem>>, %arg3: memref<1x96xf32, #tpu.memory_space<vmem>>, %arg4: memref<32x32xf32, #tpu.memory_space<vmem>>, %arg5: memref<1x32xf32, #tpu.memory_space<vmem>>, %arg6: memref<1x8x32xf32, #tpu.memory_space<vmem>>, %arg7: memref<1x8x8xf32, #tpu.memory_space<vmem>>, %arg8: memref<8x32xf32, #tpu.memory_space<vmem>>) attributes {dimension_semantics = [#tpu.dimension_semantics<parallel>], iteration_bounds = array<i64: 2>, scalar_prefetch = 0 : i64, scratch_operands = 1 : i64, tpu.core_type = #tpu.core_type<tc>, window_params = [{transform_indices = @transform_0, window_bounds = array<i64: 1, 8, 32>}, {pipeline_mode = #tpu.pipeline_mode<synchronous>, transform_indices = @transform_1, window_bounds = array<i64: 32, 96>}, {pipeline_mode = #tpu.pipeline_mode<synchronous>, transform_indices = @transform_2, window_bounds = array<i64: 1, 96>}, {pipeline_mode = #tpu.pipeline_mode<synchronous>, transform_indices = @transform_3, window_bounds = array<i64: 32, 32>}, {pipeline_mode = #tpu.pipeline_mode<synchronous>, transform_indices = @transform_4, window_bounds = array<i64: 1, 32>}, {transform_indices = @transform_5, window_bounds = array<i64: 1, 8, 32>}, {transform_indices = @transform_6, window_bounds = array<i64: 1, 8, 8>}]} {
    %c0 = arith.constant 0 : index
    %c0_0 = arith.constant 0 : index
    %c0_1 = arith.constant 0 : index
    %0 = vector.load %arg1[%c0, %c0_0, %c0_1] : memref<1x8x32xf32, #tpu.memory_space<vmem>>, vector<1x8x32xf32>
    %1 = vector.shape_cast %0 : vector<1x8x32xf32> to vector<8x32xf32>
    %c0_2 = arith.constant 0 : index
    %c0_3 = arith.constant 0 : index
    %2 = vector.load %arg2[%c0_2, %c0_3] : memref<32x96xf32, #tpu.memory_space<vmem>>, vector<32x96xf32>
    %cst = arith.constant dense<0.000000e+00> : vector<8x96xf32>
    %3 = tpu.matmul %1, %2, %cst {dimension_numbers = #tpu.dot_dimension_numbers<[1], [0], [0], [1], [0, 0, 1, 1], [], []>} : vector<8x32xf32>, vector<32x96xf32>, vector<8x96xf32> -> vector<8x96xf32>
    %c0_4 = arith.constant 0 : index
    %c0_5 = arith.constant 0 : index
    %4 = vector.load %arg3[%c0_4, %c0_5] : memref<1x96xf32, #tpu.memory_space<vmem>>, vector<1x96xf32>
    %5 = vector.broadcast %4 : vector<1x96xf32> to vector<8x96xf32>
    %6 = arith.addf %3, %5 : vector<8x96xf32>
    %7 = vector.extract_strided_slice %6 {offsets = [0, 0], sizes = [8, 8], strides = [1, 1]} : vector<8x96xf32> to vector<8x8xf32>
    %8 = vector.extract_strided_slice %6 {offsets = [0, 32], sizes = [8, 8], strides = [1, 1]} : vector<8x96xf32> to vector<8x8xf32>
    %9 = vector.extract_strided_slice %6 {offsets = [0, 64], sizes = [8, 8], strides = [1, 1]} : vector<8x96xf32> to vector<8x8xf32>
    %cst_6 = arith.constant dense<0.000000e+00> : vector<8x8xf32>
    %10 = tpu.matmul %7, %8, %cst_6 {dimension_numbers = #tpu.dot_dimension_numbers<[1], [1], [0], [0], [0, 0, 1, 0], [], []>} : vector<8x8xf32>, vector<8x8xf32>, vector<8x8xf32> -> vector<8x8xf32>
    %cst_7 = arith.constant dense<0xFF800000> : vector<8xf32>
    %11 = vector.multi_reduction <maximumf>, %10, %cst_7 [1] : vector<8x8xf32> to vector<8xf32>
    %12 = vector.shape_cast %11 : vector<8xf32> to vector<8x1xf32>
    %13 = vector.broadcast %12 : vector<8x1xf32> to vector<8x8xf32>
    %14 = arith.subf %10, %13 : vector<8x8xf32>
    %15 = math.exp %14 : vector<8x8xf32>
    %cst_8 = arith.constant dense<0.000000e+00> : vector<8xf32>
    %16 = vector.multi_reduction <add>, %15, %cst_8 [1] : vector<8x8xf32> to vector<8xf32>
    %17 = vector.shape_cast %16 : vector<8xf32> to vector<8x1xf32>
    %18 = tpu.reciprocal %17 {approx = true} : vector<8x1xf32> -> vector<8x1xf32>
    %19 = vector.broadcast %18 : vector<8x1xf32> to vector<8x8xf32>
    %20 = arith.mulf %15, %19 : vector<8x8xf32>
    %cst_9 = arith.constant dense<0.000000e+00> : vector<8x8xf32>
    %21 = tpu.matmul %20, %9, %cst_9 {dimension_numbers = #tpu.dot_dimension_numbers<[1], [0], [0], [1], [0, 0, 1, 1], [], []>} : vector<8x8xf32>, vector<8x8xf32>, vector<8x8xf32> -> vector<8x8xf32>
    %c0_10 = arith.constant 0 : index
    %c0_11 = arith.constant 0 : index
    %22 = vector.load %arg8[%c0_10, %c0_11] : memref<8x32xf32, #tpu.memory_space<vmem>>, vector<8x8xf32>
    tpu.vector_store %arg8[%c0_10, %c0_11], %21 {strides = array<i32>} : memref<8x32xf32, #tpu.memory_space<vmem>>, vector<8x8xf32>,
    %23 = vector.extract_strided_slice %6 {offsets = [0, 8], sizes = [8, 8], strides = [1, 1]} : vector<8x96xf32> to vector<8x8xf32>
    %24 = vector.extract_strided_slice %6 {offsets = [0, 40], sizes = [8, 8], strides = [1, 1]} : vector<8x96xf32> to vector<8x8xf32>
    %25 = vector.extract_strided_slice %6 {offsets = [0, 72], sizes = [8, 8], strides = [1, 1]} : vector<8x96xf32> to vector<8x8xf32>
    %cst_12 = arith.constant dense<0.000000e+00> : vector<8x8xf32>
    %26 = tpu.matmul %23, %24, %cst_12 {dimension_numbers = #tpu.dot_dimension_numbers<[1], [1], [0], [0], [0, 0, 1, 0], [], []>} : vector<8x8xf32>, vector<8x8xf32>, vector<8x8xf32> -> vector<8x8xf32>
    %cst_13 = arith.constant dense<0xFF800000> : vector<8xf32>
    %27 = vector.multi_reduction <maximumf>, %26, %cst_13 [1] : vector<8x8xf32> to vector<8xf32>
    %28 = vector.shape_cast %27 : vector<8xf32> to vector<8x1xf32>
    %29 = vector.broadcast %28 : vector<8x1xf32> to vector<8x8xf32>
    %30 = arith.subf %26, %29 : vector<8x8xf32>
    %31 = math.exp %30 : vector<8x8xf32>
    %cst_14 = arith.constant dense<0.000000e+00> : vector<8xf32>
    %32 = vector.multi_reduction <add>, %31, %cst_14 [1] : vector<8x8xf32> to vector<8xf32>
    %33 = vector.shape_cast %32 : vector<8xf32> to vector<8x1xf32>
    %34 = tpu.reciprocal %33 {approx = true} : vector<8x1xf32> -> vector<8x1xf32>
    %35 = vector.broadcast %34 : vector<8x1xf32> to vector<8x8xf32>
    %36 = arith.mulf %31, %35 : vector<8x8xf32>
    %37 = arith.addf %20, %36 : vector<8x8xf32>
    %cst_15 = arith.constant dense<0.000000e+00> : vector<8x8xf32>
    %38 = tpu.matmul %36, %25, %cst_15 {dimension_numbers = #tpu.dot_dimension_numbers<[1], [0], [0], [1], [0, 0, 1, 1], [], []>} : vector<8x8xf32>, vector<8x8xf32>, vector<8x8xf32> -> vector<8x8xf32>
    %c0_16 = arith.constant 0 : index
    %c8 = arith.constant 8 : index
    %39 = vector.load %arg8[%c0_16, %c8] : memref<8x32xf32, #tpu.memory_space<vmem>>, vector<8x8xf32>
    tpu.vector_store %arg8[%c0_16, %c8], %38 {strides = array<i32>} : memref<8x32xf32, #tpu.memory_space<vmem>>, vector<8x8xf32>,
    %40 = vector.extract_strided_slice %6 {offsets = [0, 16], sizes = [8, 8], strides = [1, 1]} : vector<8x96xf32> to vector<8x8xf32>
    %41 = vector.extract_strided_slice %6 {offsets = [0, 48], sizes = [8, 8], strides = [1, 1]} : vector<8x96xf32> to vector<8x8xf32>
    %42 = vector.extract_strided_slice %6 {offsets = [0, 80], sizes = [8, 8], strides = [1, 1]} : vector<8x96xf32> to vector<8x8xf32>
    %cst_17 = arith.constant dense<0.000000e+00> : vector<8x8xf32>
    %43 = tpu.matmul %40, %41, %cst_17 {dimension_numbers = #tpu.dot_dimension_numbers<[1], [1], [0], [0], [0, 0, 1, 0], [], []>} : vector<8x8xf32>, vector<8x8xf32>, vector<8x8xf32> -> vector<8x8xf32>
    %cst_18 = arith.constant dense<0xFF800000> : vector<8xf32>
    %44 = vector.multi_reduction <maximumf>, %43, %cst_18 [1] : vector<8x8xf32> to vector<8xf32>
    %45 = vector.shape_cast %44 : vector<8xf32> to vector<8x1xf32>
    %46 = vector.broadcast %45 : vector<8x1xf32> to vector<8x8xf32>
    %47 = arith.subf %43, %46 : vector<8x8xf32>
    %48 = math.exp %47 : vector<8x8xf32>
    %cst_19 = arith.constant dense<0.000000e+00> : vector<8xf32>
    %49 = vector.multi_reduction <add>, %48, %cst_19 [1] : vector<8x8xf32> to vector<8xf32>
    %50 = vector.shape_cast %49 : vector<8xf32> to vector<8x1xf32>
    %51 = tpu.reciprocal %50 {approx = true} : vector<8x1xf32> -> vector<8x1xf32>
    %52 = vector.broadcast %51 : vector<8x1xf32> to vector<8x8xf32>
    %53 = arith.mulf %48, %52 : vector<8x8xf32>
    %54 = arith.addf %37, %53 : vector<8x8xf32>
    %cst_20 = arith.constant dense<0.000000e+00> : vector<8x8xf32>
    %55 = tpu.matmul %53, %42, %cst_20 {dimension_numbers = #tpu.dot_dimension_numbers<[1], [0], [0], [1], [0, 0, 1, 1], [], []>} : vector<8x8xf32>, vector<8x8xf32>, vector<8x8xf32> -> vector<8x8xf32>
    %c0_21 = arith.constant 0 : index
    %c16 = arith.constant 16 : index
    %56 = vector.load %arg8[%c0_21, %c16] : memref<8x32xf32, #tpu.memory_space<vmem>>, vector<8x8xf32>
    tpu.vector_store %arg8[%c0_21, %c16], %55 {strides = array<i32>} : memref<8x32xf32, #tpu.memory_space<vmem>>, vector<8x8xf32>,
    %57 = vector.extract_strided_slice %6 {offsets = [0, 24], sizes = [8, 8], strides = [1, 1]} : vector<8x96xf32> to vector<8x8xf32>
    %58 = vector.extract_strided_slice %6 {offsets = [0, 56], sizes = [8, 8], strides = [1, 1]} : vector<8x96xf32> to vector<8x8xf32>
    %59 = vector.extract_strided_slice %6 {offsets = [0, 88], sizes = [8, 8], strides = [1, 1]} : vector<8x96xf32> to vector<8x8xf32>
    %cst_22 = arith.constant dense<0.000000e+00> : vector<8x8xf32>
    %60 = tpu.matmul %57, %58, %cst_22 {dimension_numbers = #tpu.dot_dimension_numbers<[1], [1], [0], [0], [0, 0, 1, 0], [], []>} : vector<8x8xf32>, vector<8x8xf32>, vector<8x8xf32> -> vector<8x8xf32>
    %cst_23 = arith.constant dense<0xFF800000> : vector<8xf32>
    %61 = vector.multi_reduction <maximumf>, %60, %cst_23 [1] : vector<8x8xf32> to vector<8xf32>
    %62 = vector.shape_cast %61 : vector<8xf32> to vector<8x1xf32>
    %63 = vector.broadcast %62 : vector<8x1xf32> to vector<8x8xf32>
    %64 = arith.subf %60, %63 : vector<8x8xf32>
    %65 = math.exp %64 : vector<8x8xf32>
    %cst_24 = arith.constant dense<0.000000e+00> : vector<8xf32>
    %66 = vector.multi_reduction <add>, %65, %cst_24 [1] : vector<8x8xf32> to vector<8xf32>
    %67 = vector.shape_cast %66 : vector<8xf32> to vector<8x1xf32>
    %68 = tpu.reciprocal %67 {approx = true} : vector<8x1xf32> -> vector<8x1xf32>
    %69 = vector.broadcast %68 : vector<8x1xf32> to vector<8x8xf32>
    %70 = arith.mulf %65, %69 : vector<8x8xf32>
    %71 = arith.addf %54, %70 : vector<8x8xf32>
    %cst_25 = arith.constant dense<0.000000e+00> : vector<8x8xf32>
    %72 = tpu.matmul %70, %59, %cst_25 {dimension_numbers = #tpu.dot_dimension_numbers<[1], [0], [0], [1], [0, 0, 1, 1], [], []>} : vector<8x8xf32>, vector<8x8xf32>, vector<8x8xf32> -> vector<8x8xf32>
    %c0_26 = arith.constant 0 : index
    %c24 = arith.constant 24 : index
    %73 = vector.load %arg8[%c0_26, %c24] : memref<8x32xf32, #tpu.memory_space<vmem>>, vector<8x8xf32>
    tpu.vector_store %arg8[%c0_26, %c24], %72 {strides = array<i32>} : memref<8x32xf32, #tpu.memory_space<vmem>>, vector<8x8xf32>,
    %cst_27 = arith.constant 2.500000e-01 : f32
    %74 = vector.broadcast %cst_27 : f32 to vector<8x8xf32>
    %75 = arith.mulf %71, %74 : vector<8x8xf32>
    %c0_28 = arith.constant 0 : index
    %c0_29 = arith.constant 0 : index
    %c0_30 = arith.constant 0 : index
    %76 = vector.load %arg7[%c0_28, %c0_29, %c0_30] : memref<1x8x8xf32, #tpu.memory_space<vmem>>, vector<1x8x8xf32>
    %77 = vector.shape_cast %76 : vector<1x8x8xf32> to vector<8x8xf32>
    %78 = vector.shape_cast %75 : vector<8x8xf32> to vector<1x8x8xf32>
    tpu.vector_store %arg7[%c0_28, %c0_29, %c0_30], %78 {strides = array<i32>} : memref<1x8x8xf32, #tpu.memory_space<vmem>>, vector<1x8x8xf32>,
    %c0_31 = arith.constant 0 : index
    %c0_32 = arith.constant 0 : index
    %79 = vector.load %arg8[%c0_31, %c0_32] : memref<8x32xf32, #tpu.memory_space<vmem>>, vector<8x32xf32>
    %c0_33 = arith.constant 0 : index
    %c0_34 = arith.constant 0 : index
    %80 = vector.load %arg4[%c0_33, %c0_34] : memref<32x32xf32, #tpu.memory_space<vmem>>, vector<32x32xf32>
    %cst_35 = arith.constant dense<0.000000e+00> : vector<8x32xf32>
    %81 = tpu.matmul %79, %80, %cst_35 {dimension_numbers = #tpu.dot_dimension_numbers<[1], [0], [0], [1], [0, 0, 1, 1], [], []>} : vector<8x32xf32>, vector<32x32xf32>, vector<8x32xf32> -> vector<8x32xf32>
    %c0_36 = arith.constant 0 : index
    %c0_37 = arith.constant 0 : index
    %82 = vector.load %arg5[%c0_36, %c0_37] : memref<1x32xf32, #tpu.memory_space<vmem>>, vector<1x32xf32>
    %83 = vector.broadcast %82 : vector<1x32xf32> to vector<8x32xf32>
    %84 = arith.addf %81, %83 : vector<8x32xf32>
    %85 = vector.shape_cast %84 : vector<8x32xf32> to vector<1x8x32xf32>
    %c0_38 = arith.constant 0 : index
    %c0_39 = arith.constant 0 : index
    %c0_40 = arith.constant 0 : index
    %86 = vector.load %arg6[%c0_38, %c0_39, %c0_40] : memref<1x8x32xf32, #tpu.memory_space<vmem>>, vector<1x8x32xf32>
    tpu.vector_store %arg6[%c0_38, %c0_39, %c0_40], %85 {strides = array<i32>} : memref<1x8x32xf32, #tpu.memory_space<vmem>>, vector<1x8x32xf32>,
    return
  }
  func.func @transform_0(%arg0: i32) -> (i32, i32, i32) {
    %c0_i32 = arith.constant 0 : i32
    %c0_i32_0 = arith.constant 0 : i32
    %c0_i32_1 = arith.constant 0 : i32
    return %arg0, %c0_i32, %c0_i32_0 : i32, i32, i32
  }
  func.func @transform_1(%arg0: i32) -> (i32, i32) {
    %c0_i32 = arith.constant 0 : i32
    %c0_i32_0 = arith.constant 0 : i32
    %c0_i32_1 = arith.constant 0 : i32
    return %c0_i32, %c0_i32_0 : i32, i32
  }
  func.func @transform_2(%arg0: i32) -> (i32, i32) {
    %c0_i32 = arith.constant 0 : i32
    %c0_i32_0 = arith.constant 0 : i32
    %c0_i32_1 = arith.constant 0 : i32
    return %c0_i32, %c0_i32_0 : i32, i32
  }
  func.func @transform_3(%arg0: i32) -> (i32, i32) {
    %c0_i32 = arith.constant 0 : i32
    %c0_i32_0 = arith.constant 0 : i32
    %c0_i32_1 = arith.constant 0 : i32
    return %c0_i32, %c0_i32_0 : i32, i32
  }
  func.func @transform_4(%arg0: i32) -> (i32, i32) {
    %c0_i32 = arith.constant 0 : i32
    %c0_i32_0 = arith.constant 0 : i32
    %c0_i32_1 = arith.constant 0 : i32
    return %c0_i32, %c0_i32_0 : i32, i32
  }
  func.func @transform_5(%arg0: i32) -> (i32, i32, i32) {
    %c0_i32 = arith.constant 0 : i32
    %c0_i32_0 = arith.constant 0 : i32
    %c0_i32_1 = arith.constant 0 : i32
    return %arg0, %c0_i32, %c0_i32_0 : i32, i32, i32
  }
  func.func @transform_6(%arg0: i32) -> (i32, i32, i32) {
    %c0_i32 = arith.constant 0 : i32
    %c0_i32_0 = arith.constant 0 : i32
    %c0_i32_1 = arith.constant 0 : i32
    return %arg0, %c0_i32, %c0_i32_0 : i32, i32, i32
  }
}

</mosaic_0001>

<bundles_post_ra>
// kernel: multihead_self_attention.1
= control target key start
LH: loop header
LB: loop body
LE: loop exit
PB: predicated region body
PF: predicated region fallthrough
CT: control target
= control target key end

     0   :  { %12 = vsyncpa [#allocation4], 0  ;;  %s1735_s0 = inlined_call_operand.vmem [shape: f32[2,8,32], index: 0, kind: input, shape index: {}]   ;;  %s1736_s1 = inlined_call_operand.vmem [shape: f32[32,96], index: 1, kind: input, shape index: {}]   ;;  %s1737_s2 = inlined_call_operand.vmem [shape: f32[1,96], index: 2, kind: input, shape index: {}]   ;;  %s1738_s3 = inlined_call_operand.vmem [shape: f32[32,32], index: 3, kind: input, shape index: {}]   ;;  %s1739_s4 = inlined_call_operand.vmem [shape: f32[1,32], index: 4, kind: input, shape index: {}]   ;;  %s1740_s5 = inlined_call_operand.vmem [shape: f32[2,8,32], index: 5, kind: output, shape index: {0}]   ;;  %s1741_s6 = inlined_call_operand.hbm [shape: f32[2,8,8], index: 6, kind: output, shape index: {1}]  }
   0x1   :  { %14 = vsyncpa [#allocation4 + $0x1], 0  ;;  %s1518_s21 = smov 0   ;;  %s1520_s22 = smov 0  }
   0x2   :  { %s1522_s23 = smov 0   ;;  %s1524_s24 = smov 0  }
   0x3 LB: > { %s1539_s25 = sadd.s32 4294967295, %s1464_s24   ;;  %s1218_s26 = sadd.s32 4294967294, %s1464_s24   ;;  %s1464_s24 = sphi %s1524_s24, %s1747_s24   ;;  %s1460_s23 = sphi %s1522_s23, %s1746_s23   ;;  %s1456_s22 = sphi %s1520_s22, %s1745_s22   ;;  %s1452_s21 = sphi %s1518_s21, %s1744_s21  }
   0x4   : > { %s1543_s27 = sadd.s32 1, %s1464_s24   ;;  %s163_s28 = sadd.s32 1, %s1460_s23 }
   0x5   : > { %s160_s29 = ssub.s32 %s1464_s24, %s1543_s27  ;;  %p173_p0 = scmp.ne.s32.totalorder %s1460_s23, %s1456_s22 }
   0x6   : > { %p161_p1 = scmp.eq.s32.totalorder %s160_s29, 0  ;;  %p174_p2 = scmp.eq.s32.totalorder %s1539_s25, 1 }
   0x7   : > { %p179_p3 = scmp.ne.s32.totalorder %s1456_s22, %s1452_s21  ;;  %p180_p4 = scmp.eq.s32.totalorder %s1218_s26, 1 }
   0x8   : > { %s1554_s30 = scalar_select %p161_p1, %s1460_s23, %s163_s28  }
   0x9   : > { %p1556_p5 = por %p174_p2, %p173_p0  ;;  %p1560_p6 = por %p180_p4, %p179_p3 }
   0xa   : > { %p1221_p7 = scmp.ge.s32.totalorder %s1464_s24, 1  ;;  %p217_p8 = scmp.lt.s32.totalorder %s1464_s24, 3 }
   0xc   : > { %p218_p9 = pnand %p1221_p7, %p217_p8 }
   0xd   : > { %p250_p10 = scmp.lt.s32.totalorder (!%p218_p9), %s1539_s25, 1  ;;  %s1468_s9 = smov (!%p218_p9), 64  }
   0xe   : > { %221 = sbr.rel (%p218_p9) target bundleno = 1912 (0x778), region = 40  ;;  %s1469_s10 = smov (!%p218_p9), 96  }
   0xf   : > { %s1470_s11 = smov (!%p218_p9), 88   ;;  %s1471_s12 = smov (!%p218_p9), 120  }
  0x10   : > { %s1472_s14 = smov (!%p218_p9), 80   ;;  %s1473_s15 = smov (!%p218_p9), 72  }
  0x11   : > { %s1474_s17 = smov (!%p218_p9), 112   ;;  %s1475_s18 = smov (!%p218_p9), 104  }
  0x12   : > { %s1476_s19 = smov (!%p218_p9), 56   ;;  %s1477_s20 = smov (!%p218_p9), 48  }
  0x13   : > { %v262_v0 = vld [vmem:[%s1736_s1 + $0x18] sm:$0xff]  ;;  %v1466_v1 = vmov 0.0   ;;  %v261_v2 = vld [vmem:[%s1736_s1 + $0x10] sm:$0xff]  ;;  %vm1467_vm0 = vmmov 0   ;;  %s1577_s13 = scalar_select %p250_p10, %s1539_s25, 1  ;;  %v260_v3 = vld [vmem:[%s1736_s1 + $0x8] sm:$0xff] }
  0x14   : > { %1271 = vmatprep.subr.mxu0 %v1466_v1  ;;  %1279 = vmatprep.mubr.msk.f32.mxu0 %vm1467_vm0, %v1466_v1  ;;  %v259_v4 = vld [vmem:[%s1736_s1] sm:$0xff]  ;;  %vm270_vm1 = vcmask 261120   ;;  %vm347_vm2 = vcmask 64512   ;;  %s247_s28 = sand.u32 1, %s1456_s22   ;;  %vm680_vm3 = vcmask 130112   ;;  %vm852_vm4 = vcmask 195712  }
  0x15   : > { %1272 = vmatpush3.msra.mxu0 %v262_v0  ;;  %1282 = vmatprep.subr.mxu1 %v1466_v1  ;;  %s1223_s16 = sshll.u32 %s1577_s13, 3  ;;  %v1225_v6 = vld [vmem:[%s1737_s2] ss:$0 sm:$0xff]  ;;  %s1663_s29 = sshll.u32 %s247_s28, 3  ;;  %vm1024_vm5 = vcmask 261312  }
  0x16   : > { %1273 = vmatprep.subr.mxu0 %v1466_v1  ;;  %1284 = vmatprep.mubr.msk.f32.mxu1 %vm1467_vm0, %v1466_v1  ;;  %s253_s26 = scalar_lea.vmem %s1735_s0, %s1223_s16 }
  0x17   : > { %1274 = vmatpush3.msra.mxu0 %v261_v2  ;;  %v258_v5 = vld [vmem:[%s253_s26] sm:$0xff]  ;;  %s1478_s26 = smov 40  }
  0x18   : > { %1275 = vmatprep.subr.mxu0 %v1466_v1 }
  0x19   : > { %1276 = vmatpush3.msra.mxu0 %v260_v3 }
  0x1a   : > { %1277 = vmatprep.subr.mxu0 %v1466_v1 }
  0x1b   : > { %1278 = vmatpush3.msra.mxu0 %v259_v4 }
  0x1c   : > { %1280 = vmatmul.mubr.msk.f32.vlgmr.msra.gmra.mxu0 %vm270_vm1, %v258_v5  ;;  %1302 = vmatprep.subr.mxu0 %v1466_v1 }
  0x1d   : > { %1304 = vmatprep.mubr.msk.f32.mxu0 %vm1467_vm0, %v1466_v1 }
  0xdc   : > { %v340_v7 = vpop.f32.mrf.mxu0 }
  0xdd   : > { %v1604_v8 = vadd.f32 %v1225_v6, %v340_v7 }
  0xde   : > { %v1281_v9 = vpop.f32.mrf.mxu0 }
  0xdf   : > { %433 = vrot.lane.b32.xlu1 %v1604_v8, %s1468_s9  ;;  %345 = vrot.lane.b32.xlu0 %v1604_v8, %s1469_s10  ;;  %s249_s9 = scalar_lea.vmem [#allocation3], %s1663_s29  ;;  %v1031_v9 = vld [vmem:[%s1738_s3 + $0x10] sm:$0xff]  ;;  %s1481_s10 = smov 24  }
  0xe3   : > { %512 = vrot.lane.b32.xlu1 %v1604_v8, %s1470_s11  ;;  %s1242_s11 = sshll.u32 %s1539_s25, 7 }
  0xe7   : > { %510 = vrot.lane.b32.xlu1 %v1604_v8, %s1471_s12  ;;  %s1135_s12 = sshll.u32 %s249_s9, 4  ;;  %s1136_s12 = int_to_ptr.vmem [resolvable:$true] %s1135_s12 }
  0xeb   : > { %684 = vrot.lane.b32.xlu1 %v1604_v8, %s1472_s14 }
 0x151   : > { %v434_v10 = vpop.permute.xlu1 %433  ;;  %v346_v11 = vpop.permute.xlu0 %345 }
 0x152   : > { %1283 = vmatpush3.xpose.msk.msra.mxu1 %vm347_vm2, %v346_v11 }
 0x153   : > { %1287 = vmatprep.subr.mxu1 %v1466_v1 }
 0x155   : > { %v513_v12 = vpop.permute.xlu1 %512  ;;  %1285 = vmatmul.mubr.msk.f32.vlgmr.msra.gmra.mxu1 %vm347_vm2, %v1604_v8 }
 0x156   : > { %1288 = vmatpush3.msra.mxu1 %v434_v10  ;;  %1289 = vmatprep.mubr.msk.f32.mxu1 %vm1467_vm0, %v1466_v1  ;;  %v1030_v10 = vld [vmem:[%s1738_s3 + $0x8] sm:$0xff] }
 0x157   : > { %1292 = vmatprep.subr.mxu1 %v1466_v1 }
 0x159   : > { %v511_v13 = vpop.permute.xlu1 %510 }
 0x15d   : > { %v685_v14 = vpop.permute.xlu1 %684 }
 0x15e   : > { %1303 = vmatpush3.xpose.msk.msra.mxu0 %vm347_vm2, %v685_v14 }
 0x15f   : > { %1312 = vmatprep.subr.mxu0 %v1466_v1 }
 0x215   : > { %v418_v15 = vpop.f32.mrf.mxu1 }
 0x216   : > { %v422_v16 = vsel %vm347_vm2, %v418_v15, -inf }
 0x217   : > { %423 = vmax.xlane.f32.xlu0 %v422_v16  ;;  %v1286_v17 = vpop.f32.mrf.mxu1 }
 0x22d   : > { %856 = vrot.lane.b32.xlu0 %v1604_v8, %s1473_s15 }
 0x2a0   : > { %v424_v18 = vpop.xlane.xlu0 %423 }
 0x2a1   : > { %v425_v19 = vsub.f32 %v418_v15, %v424_v18 }
 0x2a3   : > { %v426_v20 = vmul.f32 1.442695, %v425_v19 }
 0x2a4   : > { %v857_v25 = vpop.permute.xlu0 %856 }
 0x2a5   : > { %1388 = vpow2.f32 %v426_v20 }
 0x2b2   : > { %v1389_v21 = vpop.eup %1388 }
 0x2b3   : > { %v428_v22 = vsel %vm347_vm2, %v1389_v21, 0.0 }
 0x2b4   : > { %429 = vadd.xlane.f32.xlu1 %v428_v22 }
 0x2c5   : > { %682 = vrot.lane.b32.xlu1 %v1604_v8, %s1474_s17  ;;  %s1133_s17 = scalar_lea.hbm %s1741_s6, %s1242_s11 }
 0x2c9   : > { %854 = vrot.lane.b32.xlu1 %v1604_v8, %s1475_s18  ;;  %s1119_s18 = scalar_lea.sflag [#allocation4], %s247_s28 }
 0x33d   : > { %v430_v23 = vpop.xlane.xlu1 %429 }
 0x33e   : > { %1390 = vrcp.f32 %v430_v23 }
 0x341   : > { %v683_v24 = vpop.permute.xlu1 %682 }
 0x342   : > { %1305 = vmatmul.mubr.msk.f32.vlgmr.msra.gmra.mxu0 %vm347_vm2, %v683_v24 }
 0x343   : > { %1313 = vmatpush3.xpose.msk.msra.mxu0 %vm347_vm2, %v857_v25  ;;  %1314 = vmatprep.mubr.msk.f32.mxu0 %vm1467_vm0, %v1466_v1 }
 0x344   : > { %1322 = vmatprep.subr.mxu0 %v1466_v1 }
 0x345   : > { %v855_v26 = vpop.permute.xlu1 %854 }
 0x346   : > { %1315 = vmatmul.mubr.msk.f32.vlgmr.msra.gmra.mxu0 %vm347_vm2, %v855_v26 }
 0x347   : > { %1330 = vmatprep.mubr.msk.f32.mxu0 %vm1467_vm0, %v1466_v1 }
 0x34b   : > { %v1391_v27 = vpop.eup %1390 }
 0x34c   : > { %v1633_v28 = vmul.f32 %v1391_v27, %v1389_v21 }
 0x34e   : > { %1290 = vmatmul.mubr.msk.f32.vlgmr.msra.gmra.mxu1 %vm347_vm2, %v1633_v28 }
 0x34f   : > { %1293 = vmatpush3.xpose.msk.msra.mxu1 %vm347_vm2, %v513_v12  ;;  %1294 = vmatprep.mubr.msk.f32.mxu1 %vm1467_vm0, %v1466_v1  ;;  %v1029_v12 = vld [vmem:[%s1738_s3] sm:$0xff] }
 0x350   : > { %1297 = vmatprep.subr.mxu1 %v1466_v1 }
 0x352   : > { %1295 = vmatmul.mubr.msk.f32.vlgmr.msra.gmra.mxu1 %vm347_vm2, %v511_v13 }
 0x353   : > { %1299 = vmatprep.mubr.msk.f32.mxu1 %vm1467_vm0, %v1466_v1 }
 0x402   : > { %v756_v29 = vpop.f32.mrf.mxu0 }
 0x403   : > { %v760_v30 = vsel %vm347_vm2, %v756_v29, -inf }
 0x404   : > { %761 = vmax.xlane.f32.xlu0 %v760_v30  ;;  %v1306_v31 = vpop.f32.mrf.mxu0 }
 0x406   : > { %v928_v32 = vpop.f32.mrf.mxu0 }
 0x407   : > { %v932_v39 = vsel %vm347_vm2, %v928_v32, -inf }
 0x408   : > { %v1316_v33 = vpop.f32.mrf.mxu0 }
 0x40e   : > { %v505_v34 = vpop.f32.mrf.mxu1 }
 0x40f   : > { %509 = vst.msk [vmem:[#allocation2] sm:$0xff] %vm347_vm2, %v505_v34 }
 0x410   : > { %v1291_v35 = vpop.f32.mrf.mxu1 }
 0x412   : > { %v584_v36 = vpop.f32.mrf.mxu1 }
 0x413   : > { %v588_v37 = vsel %vm347_vm2, %v584_v36, -inf }
 0x414   : > { %589 = vmax.xlane.f32.xlu1 %v588_v37  ;;  %v1296_v38 = vpop.f32.mrf.mxu1 }
 0x418   : > { %933 = vmax.xlane.f32.xlu1 %v932_v39 }
 0x48d   : > { %v762_v40 = vpop.xlane.xlu0 %761 }
 0x48e   : > { %v763_v41 = vsub.f32 %v756_v29, %v762_v40 }
 0x490   : > { %v764_v42 = vmul.f32 1.442695, %v763_v41 }
 0x492   : > { %1392 = vpow2.f32 %v764_v42 }
 0x49d   : > { %v590_v43 = vpop.xlane.xlu1 %589 }
 0x49e   : > { %v591_v51 = vsub.f32 %v584_v36, %v590_v43 }
 0x49f   : > { %v1393_v44 = vpop.eup %1392 }
 0x4a0   : > { %v766_v45 = vsel %vm347_vm2, %v1393_v44, 0.0  ;;  %v592_v52 = vmul.f32 1.442695, %v591_v51 }
 0x4a1   : > { %767 = vadd.xlane.f32.xlu1 %v766_v45  ;;  %v934_v46 = vpop.xlane.xlu1 %933 }
 0x4a2   : > { %v935_v47 = vsub.f32 %v928_v32, %v934_v46 }
 0x4a4   : > { %v936_v48 = vmul.f32 1.442695, %v935_v47 }
 0x4a6   : > { %1394 = vpow2.f32 %v936_v48 }
 0x4a7   : > { %1396 = vpow2.f32 %v592_v52 }
 0x4b2   : > { %600 = vrot.lane.b32.xlu1 %v1604_v8, %s1476_s19  ;;  %s1404_s19 = scalar_lea.vmem %s1136_s12, 128 }
 0x4b3   : > { %v1395_v49 = vpop.eup %1394  ;;  %p1405_p11 = scmp.ne.s32.totalorder %s1136_s12, %s1404_s19 }
 0x4b4   : > { %v938_v50 = vsel %vm347_vm2, %v1395_v49, 0.0  ;;  %v1397_v53 = vpop.eup %1396 }
 0x4b5   : > { %939 = vadd.xlane.f32.xlu0 %v938_v50  ;;  %v594_v54 = vsel %vm347_vm2, %v1397_v53, 0.0  ;;  %p1406_p12 = pnand %p1405_p11, %p1556_p5 }
 0x4b7   : > { %p1407_p13 = pneg %p1406_p12 }
 0x4cb   : > { %772 = vrot.lane.b32.xlu0 %v1604_v8, %s1477_s20  ;;  %s1479_s20 = smov 8  }
 0x4d6   : > { %595 = vadd.xlane.f32.xlu1 %v594_v54 }
 0x4e7   : > { %944 = vrot.lane.b32.xlu1 %v1604_v8, %s1478_s26  ;;  %v1032_v8 = vld [vmem:[%s1738_s3 + $0x18] sm:$0xff]  ;;  %s1480_s26 = smov 16  }
 0x4e8   : > { %1323 = vmatpush3.msra.mxu0 %v1032_v8 }
 0x4e9   : > { %1324 = vmatprep.subr.mxu0 %v1466_v1 }
 0x4ea   : > { %1325 = vmatpush3.msra.mxu0 %v1031_v9 }
 0x4eb   : > { %1326 = vmatprep.subr.mxu0 %v1466_v1 }
 0x4ec   : > { %1327 = vmatpush3.msra.mxu0 %v1030_v10 }
 0x4ed   : > { %1328 = vmatprep.subr.mxu0 %v1466_v1 }
 0x4ee   : > { %1329 = vmatpush3.msra.mxu0 %v1029_v12 }
 0x52a   : > { %v768_v55 = vpop.xlane.xlu1 %767 }
 0x52b   : > { %1398 = vrcp.f32 %v768_v55 }
 0x52e   : > { %v601_v56 = vpop.permute.xlu1 %600 }
 0x52f   : > { %1298 = vmatpush3.msra.mxu1 %v601_v56 }
 0x530   : > { %1307 = vmatprep.subr.mxu1 %v1466_v1 }
 0x538   : > { %v1399_v59 = vpop.eup %1398 }
 0x539   : > { %v770_v0 = vmul.f32 %v1399_v59, %v1393_v44 }
 0x53e   : > { %v940_v57 = vpop.xlane.xlu0 %939 }
 0x542   : > { %v773_v63 = vpop.permute.xlu0 %772 }
 0x55f   : > { %v596_v58 = vpop.xlane.xlu1 %595 }
 0x560   : > { %1400 = vrcp.f32 %v596_v58 }
 0x561   : > { %1402 = vrcp.f32 %v940_v57 }
 0x563   : > { %v945_v5 = vpop.permute.xlu1 %944 }
 0x56d   : > { %v1401_v60 = vpop.eup %1400 }
 0x56e   : > { %v598_v61 = vmul.f32 %v1401_v60, %v1397_v53  ;;  %v1403_v62 = vpop.eup %1402 }
 0x56f   : > { %v942_v3 = vmul.f32 %v1403_v62, %v1395_v49 }
 0x570   : > { %1300 = vmatmul.mubr.msk.f32.vlgmr.msra.gmra.mxu1 %vm347_vm2, %v598_v61  ;;  %v599_v2 = vadd.f32 %v598_v61, %v1633_v28 }
 0x571   : > { %1308 = vmatpush3.msra.mxu1 %v773_v63  ;;  %1309 = vmatprep.mubr.msk.f32.mxu1 %vm1467_vm0, %v1466_v1 }
 0x572   : > { %1317 = vmatprep.subr.mxu1 %v1466_v1  ;;  %v771_v4 = vadd.f32 %v770_v0, %v599_v2 }
 0x574   : > { %1310 = vmatmul.mubr.msk.f32.vlgmr.msra.gmra.mxu1 %vm347_vm2, %v770_v0  ;;  %v943_v6 = vadd.f32 %v942_v3, %v771_v4 }
 0x575   : > { %1318 = vmatpush3.msra.mxu1 %v945_v5  ;;  %1319 = vmatprep.mubr.msk.f32.mxu1 %vm1467_vm0, %v1466_v1 }
 0x576   : > { %v1026_v7 = vmul.f32 0.25, %v943_v6 }
 0x578   : > { %1320 = vmatmul.mubr.msk.f32.vlgmr.msra.gmra.mxu1 %vm347_vm2, %v942_v3  ;;  %1027 = vst.msk [vmem:[%s249_s9] sm:$0xff] %vm347_vm2, %v1026_v7 }
 0x630   : > { %v672_v11 = vpop.f32.mrf.mxu1 }
 0x631   : > { %677 = vrot.lane.b32.xlu1 %v672_v11, %s1479_s20  ;;  %s1482_s20 = smov [#allocation3]  }
 0x632   : > { %v1301_v13 = vpop.f32.mrf.mxu1 }
 0x634   : > { %v844_v14 = vpop.f32.mrf.mxu1 }
 0x635   : > { %849 = vrot.lane.b32.xlu0 %v844_v14, %s1480_s26  ;;  %s1408_s26 = sshll.u32 %s1482_s20, 4  ;;  %s1409_s26 = int_to_ptr.vmem [resolvable:$false] %s1408_s26 }
 0x636   : > { %v1311_v15 = vpop.f32.mrf.mxu1  ;;  %p1411_p0 = scmp.lt.s32.totalorder %s1136_s12, %s1409_s26 }
 0x638   : > { %v1016_v16 = vpop.f32.mrf.mxu1 }
 0x639   : > { %1021 = vrot.lane.b32.xlu1 %v1016_v16, %s1481_s10  ;;  %s1410_s10 = scalar_lea.vmem %s1409_s26, 256 }
 0x63a   : > { %v1321_v17 = vpop.f32.mrf.mxu1  ;;  %p1412_p1 = scmp.lt.s32.totalorder %s1410_s10, %s1404_s19 }
 0x63c   : > { %p1413_p2 = por %p1412_p1, %p1411_p0 }
 0x63e   : > { %p1414_p3 = pnand %p1413_p2, %p1407_p13 }
 0x6a3   : > { %v678_v18 = vpop.permute.xlu1 %677 }
 0x6a4   : > { %681 = vst.msk [vmem:[#allocation2] sm:$0xff] %vm680_vm3, %v678_v18 }
 0x6a7   : > { %v850_v19 = vpop.permute.xlu0 %849 }
 0x6a8   : > { %853 = vst.msk [vmem:[#allocation2] sm:$0xff] %vm852_vm4, %v850_v19 }
 0x6ab   : > { %v1022_v1 = vpop.permute.xlu1 %1021 }
 0x6ac   : > { %1025 = vst.msk [vmem:[#allocation2] sm:$0xff] %vm1024_vm5, %v1022_v1 }
 0x6b3   : > { %v1028_v20 = vld [vmem:[#allocation2] sm:$0xff] }
 0x6b4   : > { %1331 = vmatmul.mubr.msk.f32.vlgmr.msra.gmra.mxu0 %vm270_vm1, %v1028_v20 }
 0x6b5   : > { %1417 = shalt.err (!%p1414_p3)
}
 0x6b6   : > { %s1418_s25 = scalar_lea.hbm %s1133_s17, 128  ;;  %s1422_s9 = scalar_lea.hbm %s1741_s6, 256 }
 0x6b7   : > { %p1419_p4 = scmp.ne.s32.totalorder %s1133_s17, %s1418_s25  ;;  %p1423_p9 = scmp.lt.s32.totalorder %s1133_s17, %s1741_s6 }
 0x6b8   : > { %p1424_p10 = scmp.lt.s32.totalorder %s1422_s9, %s1418_s25 }
 0x6b9   : > { %p1420_p7 = pnand %p1419_p4, %p1556_p5 }
 0x6ba   : > { %p1425_p11 = por %p1424_p10, %p1423_p9 }
 0x6bb   : > { %p1421_p8 = pneg %p1420_p7 }
 0x6bd   : > { %p1426_p12 = pnand %p1425_p11, %p1421_p8 }
 0x6bf   : > { %1429 = shalt.err (!%p1426_p12)
}
 0x6c0   : > { %1333 = dma.vmem_to_hbm [thread:$0]  (%p1556_p5), %s1136_s12, 128, %s1133_s17, %s1119_s18   ;;  %v1239_v21 = vld [vmem:[%s1739_s4] ss:$0 sm:$0xff] }
 0x6c1   : > { %s257_s10 = scalar_lea.vmem %s1740_s5, %s1223_s16 }
 0x774   : > { %v1109_v22 = vpop.f32.mrf.mxu0 }
 0x775   : > { %v1110_v23 = vadd.f32 %v1239_v21, %v1109_v22 }
 0x776   : > { %v1332_v24 = vpop.f32.mrf.mxu0 }
 0x777   : > { %1113 = vst.msk [vmem:[%s257_s10] sm:$0xff] %vm270_vm1, %v1110_v23 }
 0x778 PF: > { %p1339_p13 = scmp.ge.s32.totalorder %s1464_s24, 2  ;;  %s1154_s7 = sand.u32 1, %s1452_s21  }
 0x779   : > { %s1155_s12 = scalar_lea.sflag [#allocation4], %s1154_s7 }
 0x77a   : > { %p1336_p5 = pnand %p1339_p13, %p1560_p6 }
 0x77c   : > { %p1337_p0 = pneg %p1336_p5 }
 0x77e   : > { %1447 = dma.done.wait (%p1337_p0), %s1155_s12, 128  }
 0x77f   : > { %1449 = vsyncadd (%p1337_p0), %s1155_s12, 4294967168  ;;  %p17_p1 = scmp.ge.s32.totalorder %s1543_s27, 4   ;;  %s1744_s21 = smov %s1456_s22 }
 0x780   : > { %s1745_s22 = smov %s1460_s23  ;;  %s1746_s23 = smov %s1554_s30 }
 0x781   : > { %s1747_s24 = smov %s1543_s27  ;;  %19 = sbr.rel (!%p17_p1) target bundleno = 3 (0x3), region = 87 }
 0x786   :  { %1160 = vsyncpa [#allocation4], 1 }
 0x787   :  { %1162 = vsyncpa [#allocation4 + $0x1], 1 }

</bundles_post_ra>
